<compile_context>
chip_gen: v5e
topology: v5e:2x2
jax: 0.10.0
libtpu: 0.0.40
codegen_flags: <defaults>
</compile_context>

<pallas_src>
import functools
import math

import jax
import jax.numpy as jnp
from jax.experimental import pallas as pl
from jax.experimental.pallas import tpu as pltpu


def _layer_norm_kernel(x_ref, g_ref, b_ref, o_ref, *, eps, d):
    """One (tm, d) row tile. g_ref/b_ref are (1, d), VMEM-resident."""
    x = x_ref[...].astype(jnp.float32)

    # Fused one-pass statistics: both reductions come from the same loaded
    # tile and can overlap on the XLU. var = (ss - s*mean)/(d-1) is the
    # unbiased (torch.std default) estimator; clamp guards fp cancellation.
    s = jnp.sum(x, axis=-1, keepdims=True)
    ss = jnp.sum(x * x, axis=-1, keepdims=True)
    mean = s * (1.0 / d)
    var = (ss - s * mean) * (1.0 / max(d - 1, 1))
    var = jnp.maximum(var, 0.0)
    std = jnp.sqrt(var)

    # Per-row reciprocal on a (tm, 1) column: EUP fast path instead of a
    # (tm, d) divide. Two Newton steps restore full f32 accuracy at
    # negligible (tm, 1) VPU cost.
    den = std + eps
    inv = pl.reciprocal(den, approx=True)
    inv = inv * (2.0 - den * inv)
    inv = inv * (2.0 - den * inv)

    gamma = g_ref[...].astype(jnp.float32)
    beta = b_ref[...].astype(jnp.float32)
    y = gamma * ((x - mean) * inv) + beta
    o_ref[...] = y.astype(o_ref.dtype)


def _round_down(n, k):
    return (n // k) * k


def _round_up(n, k):
    return ((n + k - 1) // k) * k


def layer_norm(x, gamma, beta, eps=1e-6):
    """Pallas LayerNorm over the last dim of x.

    x:     [..., d]
    gamma: [d]   (a_2 in the reference)
    beta:  [d]   (b_2 in the reference)
    """
    *lead, d = x.shape
    m = math.prod(lead) if lead else 1
    x2 = x.reshape(m, d)
    g2 = gamma.reshape(1, d)
    b2 = beta.reshape(1, d)

    itemsize = jnp.dtype(x.dtype).itemsize
    # Sublane packing: 8 rows/vreg for 4-byte, 16 for 2-byte, 32 for 1-byte.
    row_align = {4: 8, 2: 16, 1: 32}.get(itemsize, 8)

    # --- Row-tile sizing (the dominant fix) -------------------------------
    # Budget: double-buffered in + out tiles (4 * tm * d * itemsize) plus
    # ~3 f32 VMEM temporaries (x_f32, centred, y). 24 MiB stays comfortably
    # under v7x's 32 MiB scoped / 64 MiB physical VMEM (and the explicit
    # vmem_limit_bytes below), while being huge compared to the old 8-row tile.
    TILE_VMEM_BUDGET = 24 * 1024 * 1024
    per_row_bytes = d * (4 * itemsize + 3 * 4)
    tm = max(row_align, TILE_VMEM_BUDGET // per_row_bytes)

    # Keep at least 2 grid steps so the "parallel" grid axis gives both v7x
    # TensorCores work (neutral on v5e/v6e).
    if m > row_align:
        tm = min(tm, _round_up(pl.cdiv(m, 2), row_align))
    tm = min(tm, m)
    if tm != m:
        # Partial (non-full-extent) blocks must keep the sublane multiple.
        tm = max(row_align, _round_down(tm, row_align))
    grid_m = pl.cdiv(m, tm)
    # No jnp.pad: Pallas handles the partial last block (out-of-bounds rows
    # are computed on stale buffer contents but never written back; per-row
    # math means they cannot poison valid rows).

    cost = pl.CostEstimate(
        flops=8 * m * d,                       # mul, 2 sums, sub, 2 mul, add, ...
        transcendentals=2 * m,                 # sqrt + reciprocal per row
        bytes_accessed=2 * m * d * itemsize + 2 * d * 4,
    )

    out = pl.pallas_call(
        functools.partial(_layer_norm_kernel, eps=eps, d=d),
        out_shape=jax.ShapeDtypeStruct((m, d), x.dtype),
        grid_spec=pltpu.PrefetchScalarGridSpec(
            num_scalar_prefetch=0,
            grid=(grid_m,),
            in_specs=[
                pl.BlockSpec((tm, d), lambda i: (i, 0)),   # x row tile
                pl.BlockSpec((1, d), lambda i: (0, 0)),    # gamma (resident)
                pl.BlockSpec((1, d), lambda i: (0, 0)),    # beta  (resident)
            ],
            out_specs=pl.BlockSpec((tm, d), lambda i: (i, 0)),
        ),
        compiler_params=pltpu.CompilerParams(
            dimension_semantics=("parallel",),
            vmem_limit_bytes=40 * 1024 * 1024,
        ),
        cost_estimate=cost,
    )(x2, g2, b2)

    return out.reshape(*lead, d)


def _ref_layer_norm(x, gamma, beta, eps=1e-6):
    mean = jnp.mean(x, axis=-1, keepdims=True)
    std = jnp.std(x, axis=-1, keepdims=True, ddof=1)  # unbiased, like torch
    return gamma * (x - mean) / (std + eps) + beta


if __name__ == "__main__":
    batch, seq, hidden = 2, 8, 32
    eps = 1e-6

    key0 = jax.random.PRNGKey(0)
    kx, kg, kb = jax.random.split(key0, 3)
    x = jax.random.normal(kx, (batch, seq, hidden), dtype=jnp.float32)

    # Deterministic init exactly as in __init__: a_2 = ones, b_2 = zeros.
    a_2 = jnp.ones((hidden,), dtype=jnp.float32)
    b_2 = jnp.zeros((hidden,), dtype=jnp.float32)

    out = layer_norm(x, a_2, b_2, eps=eps)
    out = jax.block_until_ready(out)
    ref = _ref_layer_norm(x, a_2, b_2, eps=eps)
    assert out.shape == (batch, seq, hidden)
    assert jnp.allclose(out, ref, atol=1e-5, rtol=1e-5)

    # Non-trivial affine params to exercise the gamma/beta path.
    gamma = jax.random.normal(kg, (hidden,), dtype=jnp.float32)
    beta = jax.random.normal(kb, (hidden,), dtype=jnp.float32)
    out2 = jax.block_until_ready(layer_norm(x, gamma, beta, eps=eps))
    ref2 = _ref_layer_norm(x, gamma, beta, eps=eps)
    assert jnp.allclose(out2, ref2, atol=1e-5, rtol=1e-5)

    # Also exercise a shape where tm does not divide the row count
    # (partial last block, no wrapper-side padding) and rows are not a
    # multiple of the tile.
    x3 = jax.random.normal(kb, (3, 7, hidden), dtype=jnp.float32)
    out3 = jax.block_until_ready(layer_norm(x3, gamma, beta, eps=eps))
    ref3 = _ref_layer_norm(x3, gamma, beta, eps=eps)
    assert jnp.allclose(out3, ref3, atol=1e-5, rtol=1e-5)

    print("KERNEL_OK")
</pallas_src>

<mosaic_0001>
module attributes {stable_mosaic.version = 11 : i64} {
  func.func @_layer_norm_kernel(%arg0: i32, %arg1: memref<8x32xf32, #tpu.memory_space<vmem>>, %arg2: memref<1x32xf32, #tpu.memory_space<vmem>>, %arg3: memref<1x32xf32, #tpu.memory_space<vmem>>, %arg4: memref<8x32xf32, #tpu.memory_space<vmem>>) attributes {dimension_semantics = [#tpu.dimension_semantics<parallel>], iteration_bounds = array<i64: 2>, scalar_prefetch = 0 : i64, scratch_operands = 0 : i64, tpu.core_type = #tpu.core_type<tc>, window_params = [{transform_indices = @transform_0, window_bounds = array<i64: 8, 32>}, {pipeline_mode = #tpu.pipeline_mode<synchronous>, transform_indices = @transform_1, window_bounds = array<i64: 1, 32>}, {pipeline_mode = #tpu.pipeline_mode<synchronous>, transform_indices = @transform_2, window_bounds = array<i64: 1, 32>}, {transform_indices = @transform_3, window_bounds = array<i64: 8, 32>}]} {
    %c0 = arith.constant 0 : index
    %c0_0 = arith.constant 0 : index
    %0 = vector.load %arg1[%c0, %c0_0] : memref<8x32xf32, #tpu.memory_space<vmem>>, vector<8x32xf32>
    %cst = arith.constant dense<0.000000e+00> : vector<8xf32>
    %1 = vector.multi_reduction <add>, %0, %cst [1] : vector<8x32xf32> to vector<8xf32>
    %2 = vector.shape_cast %1 : vector<8xf32> to vector<8x1xf32>
    %3 = arith.mulf %0, %0 : vector<8x32xf32>
    %cst_1 = arith.constant dense<0.000000e+00> : vector<8xf32>
    %4 = vector.multi_reduction <add>, %3, %cst_1 [1] : vector<8x32xf32> to vector<8xf32>
    %5 = vector.shape_cast %4 : vector<8xf32> to vector<8x1xf32>
    %cst_2 = arith.constant 3.125000e-02 : f32
    %6 = vector.broadcast %cst_2 : f32 to vector<8x1xf32>
    %7 = arith.mulf %2, %6 : vector<8x1xf32>
    %8 = arith.mulf %2, %7 : vector<8x1xf32>
    %9 = arith.subf %5, %8 : vector<8x1xf32>
    %cst_3 = arith.constant 0.0322580636 : f32
    %10 = vector.broadcast %cst_3 : f32 to vector<8x1xf32>
    %11 = arith.mulf %9, %10 : vector<8x1xf32>
    %cst_4 = arith.constant 0.000000e+00 : f32
    %12 = vector.broadcast %cst_4 : f32 to vector<8x1xf32>
    %13 = arith.maximumf %11, %12 : vector<8x1xf32>
    %14 = math.sqrt %13 : vector<8x1xf32>
    %cst_5 = arith.constant 9.99999997E-7 : f32
    %15 = vector.broadcast %cst_5 : f32 to vector<8x1xf32>
    %16 = arith.addf %14, %15 : vector<8x1xf32>
    %17 = tpu.reciprocal %16 {approx = true} : vector<8x1xf32> -> vector<8x1xf32>
    %18 = arith.mulf %16, %17 : vector<8x1xf32>
    %cst_6 = arith.constant 2.000000e+00 : f32
    %19 = vector.broadcast %cst_6 : f32 to vector<8x1xf32>
    %20 = arith.subf %19, %18 : vector<8x1xf32>
    %21 = arith.mulf %17, %20 : vector<8x1xf32>
    %22 = arith.mulf %16, %21 : vector<8x1xf32>
    %cst_7 = arith.constant 2.000000e+00 : f32
    %23 = vector.broadcast %cst_7 : f32 to vector<8x1xf32>
    %24 = arith.subf %23, %22 : vector<8x1xf32>
    %25 = arith.mulf %21, %24 : vector<8x1xf32>
    %c0_8 = arith.constant 0 : index
    %c0_9 = arith.constant 0 : index
    %26 = vector.load %arg2[%c0_8, %c0_9] : memref<1x32xf32, #tpu.memory_space<vmem>>, vector<1x32xf32>
    %c0_10 = arith.constant 0 : index
    %c0_11 = arith.constant 0 : index
    %27 = vector.load %arg3[%c0_10, %c0_11] : memref<1x32xf32, #tpu.memory_space<vmem>>, vector<1x32xf32>
    %28 = vector.broadcast %7 : vector<8x1xf32> to vector<8x32xf32>
    %29 = arith.subf %0, %28 : vector<8x32xf32>
    %30 = vector.broadcast %25 : vector<8x1xf32> to vector<8x32xf32>
    %31 = arith.mulf %29, %30 : vector<8x32xf32>
    %32 = vector.broadcast %26 : vector<1x32xf32> to vector<8x32xf32>
    %33 = arith.mulf %32, %31 : vector<8x32xf32>
    %34 = vector.broadcast %27 : vector<1x32xf32> to vector<8x32xf32>
    %35 = arith.addf %33, %34 : vector<8x32xf32>
    %c0_12 = arith.constant 0 : index
    %c0_13 = arith.constant 0 : index
    %36 = vector.load %arg4[%c0_12, %c0_13] : memref<8x32xf32, #tpu.memory_space<vmem>>, vector<8x32xf32>
    tpu.vector_store %arg4[%c0_12, %c0_13], %35 {strides = array<i32>} : memref<8x32xf32, #tpu.memory_space<vmem>>, vector<8x32xf32>,
    return
  }
  func.func @transform_0(%arg0: i32) -> (i32, i32) {
    %c0_i32 = arith.constant 0 : i32
    %c0_i32_0 = arith.constant 0 : i32
    return %arg0, %c0_i32 : i32, i32
  }
  func.func @transform_1(%arg0: i32) -> (i32, i32) {
    %c0_i32 = arith.constant 0 : i32
    %c0_i32_0 = arith.constant 0 : i32
    %c0_i32_1 = arith.constant 0 : i32
    return %c0_i32, %c0_i32_0 : i32, i32
  }
  func.func @transform_2(%arg0: i32) -> (i32, i32) {
    %c0_i32 = arith.constant 0 : i32
    %c0_i32_0 = arith.constant 0 : i32
    %c0_i32_1 = arith.constant 0 : i32
    return %c0_i32, %c0_i32_0 : i32, i32
  }
  func.func @transform_3(%arg0: i32) -> (i32, i32) {
    %c0_i32 = arith.constant 0 : i32
    %c0_i32_0 = arith.constant 0 : i32
    return %arg0, %c0_i32 : i32, i32
  }
}

</mosaic_0001>

<bundles_post_ra>
// kernel: tpu_custom_call.1
= control target key start
LH: loop header
LB: loop body
LE: loop exit
PB: predicated region body
PF: predicated region fallthrough
CT: control target
= control target key end

     0   :  { %8 = vsyncpa [#allocation3], 0  ;;  %s724_s0 = inlined_call_operand.hbm [shape: f32[16,32], index: 0, kind: input, shape index: {}]   ;;  %s725_s1 = inlined_call_operand.hbm [shape: f32[1,32], index: 1, kind: input, shape index: {}]   ;;  %s726_s2 = inlined_call_operand.vmem [shape: f32[1,32], index: 2, kind: input, shape index: {}]   ;;  %s727_s3 = inlined_call_operand.hbm [shape: f32[16,32], index: 3, kind: output, shape index: {}]  }
   0x1   :  { %10 = vsyncpa [#allocation3 + $0x1], 0 }
   0x2   :  { %11 = vsyncpa [#allocation6], 0 }
   0x3   :  { %12 = vsyncpa [#allocation4], 0 }
   0x4   :  { %14 = vsyncpa [#allocation4 + $0x1], 0  ;;  %s576_s12 = smov 0   ;;  %s578_s13 = smov 0  }
   0x5   :  { %s580_s14 = smov 0   ;;  %s582_s15 = smov 0  }
   0x6 LB: > { %s597_s16 = sadd.s32 4294967295, %s553_s15   ;;  %s346_s17 = sadd.s32 4294967294, %s553_s15   ;;  %s553_s15 = sphi %s582_s15, %s737_s15   ;;  %s549_s14 = sphi %s580_s14, %s736_s14   ;;  %s545_s13 = sphi %s578_s13, %s735_s13   ;;  %s541_s12 = sphi %s576_s12, %s734_s12  }
   0x7   : > { %p40_p0 = scmp.ne.s32.totalorder %s545_s13, %s541_s12  ;;  %p41_p1 = scmp.eq.s32.totalorder %s597_s16, 0 }
   0x8   : > { %p106_p2 = scmp.eq.s32.totalorder %s597_s16, 1  ;;  %p112_p3 = scmp.eq.s32.totalorder %s346_s17, 1 }
   0x9   : > { %p606_p4 = por %p41_p1, %p40_p0  ;;  %p347_p5 = scmp.ge.s32.totalorder %s553_s15, 1 }
   0xa   : > { %p611_p6 = por %p112_p3, %p40_p0  ;;  %p119_p7 = scmp.lt.s32.totalorder %s553_s15, 3 }
   0xb   : > { %s131_s22 = sshll.u32 %s725_s1, 4  ;;  %s555_s24 = smov [#allocation5]   ;;  %s132_s22 = int_to_ptr.hbm [resolvable:$true] %s131_s22 }
   0xc   : > { %p619_p8 = pnand %p347_p5, %p119_p7  ;;  %s133_s25 = sshll.u32 %s555_s24, 4  ;;  %s134_s25 = int_to_ptr.vmem [resolvable:$true] %s133_s25 }
   0xd   : > { %s629_s26 = sadd.s32 1, %s553_s15   ;;  %s27_s27 = sadd.s32 1, %s549_s14 }
   0xe   : > { %p368_p10 = pneg %p619_p8  ;;  %s24_s28 = ssub.s32 %s553_s15, %s629_s26 }
   0xf   : > { %p25_p12 = scmp.eq.s32.totalorder %s24_s28, 0  ;;  %p34_p13 = scmp.ne.s32.totalorder %s549_s14, %s545_s13 }
  0x10   : > { %p369_p11 = pnand %p368_p10, %p41_p1  ;;  %p35_p0 = scmp.eq.s32.totalorder %s553_s15, 0 }
  0x11   : > { %s638_s29 = scalar_select %p25_p12, %s549_s14, %s27_s27  }
  0x12   : > { %371 = dma.hbm_to_vmem [thread:$0]  (!%p369_p11), %s132_s22, 16, %s134_s25, [#allocation6]  }
  0x13   : > { %p642_p3 = por %p106_p2, %p34_p13  ;;  %p381_p5 = scmp.lt.s32.totalorder %s553_s15, 2 }
  0x14   : > { %s147_s4 = sand.u32 1, %s549_s14   ;;  %s351_s5 = sshll.u32 %s553_s15, 3 }
  0x15   : > { %p36_p7 = por %p35_p0, %p34_p13  ;;  %s350_s6 = sshll.u32 %s147_s4, 3 }
  0x16   : > { %s155_s9 = scalar_lea.hbm %s724_s0, %s351_s5  ;;  %s151_s11 = scalar_lea.vmem [#allocation2], %s350_s6 }
  0x17   : > { %s157_s10 = sshll.u32 %s155_s9, 4  ;;  %s159_s17 = sshll.u32 %s151_s11, 4  ;;  %s158_s10 = int_to_ptr.hbm [resolvable:$true] %s157_s10  ;;  %s160_s17 = int_to_ptr.vmem [resolvable:$true] %s159_s17 }
  0x18   : > { %p652_p10 = pnand %p381_p5, %p36_p7  ;;  %s148_s21 = scalar_lea.sflag [#allocation3], %s147_s4 }
  0x19   : > { %s453_s22 = sshra.s32 %s158_s10, 4  ;;  %s460_s28 = scalar_lea.hbm %s724_s0, 16  ;;  %s454_s22 = int_to_ptr.hbm [resolvable:$true] %s453_s22 }
  0x1a   : > { %s455_s24 = scalar_lea.hbm %s454_s22, 8  ;;  %p457_p11 = pneg %p652_p10 }
  0x1b   : > { %p456_p2 = scmp.ne.s32.totalorder %s454_s22, %s455_s24  ;;  %p461_p0 = scmp.lt.s32.totalorder %s454_s22, %s724_s0 }
  0x1c   : > { %p462_p5 = scmp.lt.s32.totalorder %s460_s28, %s455_s24 }
  0x1d   : > { %p458_p12 = pnand %p457_p11, %p456_p2 }
  0x1e   : > { %p463_p7 = por %p462_p5, %p461_p0 }
  0x1f   : > { %p459_p13 = pneg %p458_p12 }
  0x21   : > { %p464_p9 = pnand %p463_p7, %p459_p13 }
  0x23   : > { %467 = shalt.err (!%p464_p9)
}
  0x24   : > { %375 = dma.hbm_to_vmem [thread:$0]  (!%p652_p10), %s158_s10, 128, %s160_s17, %s148_s21  }
  0x25   : > { %168 = sbr.rel (%p619_p8) target bundleno = 228 (0xe4), region = 32  ;;  %s669_s4 = sand.u32 (!%p619_p8), 1, %s545_s13  }
  0x26   : > { %s353_s7 = sshll.u32 (!%p619_p8), %s669_s4, 3  ;;  %s171_s8 = scalar_lea.sflag (!%p619_p8), [#allocation3], %s669_s4 }
  0x27   : > { %s174_s9 = scalar_lea.vmem (!%p619_p8), [#allocation2], %s353_s7 }
  0x2a   : > { %528 = dma.done.wait (%p606_p4), %s171_s8, 128  }
  0x2b   : > { %530 = vsyncadd (%p606_p4), %s171_s8, 4294967168 }
  0x2c   : > { %532 = dma.done.wait (%p41_p1), [#allocation6], 16  }
  0x2d   : > { %534 = vsyncadd (%p41_p1), [#allocation6], 4294967280  ;;  %vm204_vm0 = vcmask 261120   ;;  %v203_v0 = vld [vmem:[%s174_s9] sm:$0xff]  ;;  %s357_s18 = sshll.u32 %s597_s16, 3  ;;  %s202_s21 = scalar_lea.vmem [#allocation7], %s353_s7 }
  0x2e   : > { %v205_v1 = vsel %vm204_vm0, %v203_v0, 0.0  ;;  %v208_v2 = vmul.f32 %v203_v0, %v203_v0  ;;  %v417_v30 = vld [vmem:[#allocation5] ss:$0 sm:$0xff]  ;;  %s261_s11 = scalar_lea.hbm %s727_s3, %s357_s18  ;;  %v418_v32 = vld [vmem:[%s726_s2] ss:$0 sm:$0xff]  ;;  %s263_s22 = sshll.u32 %s202_s21, 4  ;;  %s264_s22 = int_to_ptr.vmem [resolvable:$true] %s263_s22 }
  0x2f   : > { %206 = vadd.xlane.f32.xlu0 %v205_v1  ;;  %s265_s24 = sshll.u32 %s261_s11, 4  ;;  %s251_s16 = scalar_lea.sflag [#allocation4], %s669_s4  ;;  %s266_s24 = int_to_ptr.hbm [resolvable:$true] %s265_s24 }
  0x30   : > { %v209_v3 = vsel %vm204_vm0, %v208_v2, 0.0  ;;  %s497_s25 = sshra.s32 %s266_s24, 4  ;;  %s503_s6 = scalar_lea.hbm %s727_s3, 16  ;;  %s498_s25 = int_to_ptr.hbm [resolvable:$true] %s497_s25 }
  0x31   : > { %s499_s27 = scalar_lea.hbm %s498_s25, 8  ;;  %p504_p9 = scmp.lt.s32.totalorder %s498_s25, %s727_s3 }
  0x32   : > { %p500_p1 = scmp.ne.s32.totalorder %s498_s25, %s499_s27  ;;  %p505_p10 = scmp.lt.s32.totalorder %s503_s6, %s499_s27 }
  0x34   : > { %p501_p4 = pnand %p500_p1, %p642_p3  ;;  %p506_p2 = por %p505_p10, %p504_p9 }
  0x36   : > { %p502_p8 = pneg %p501_p4 }
  0x37   : > { %210 = vadd.xlane.f32.xlu0 %v209_v3 }
  0x38   : > { %p507_p11 = pnand %p506_p2, %p502_p8 }
  0xa2   : > { %v207_v4 = vpop.xlane.xlu0 %206 }
  0xa3   : > { %v212_v5 = vmul.f32 0.03125, %v207_v4 }
  0xa5   : > { %v213_v6 = vmul.f32 %v212_v5, %v207_v4  ;;  %v239_v28 = vsub.f32 %v203_v0, %v212_v5 }
  0xaa   : > { %v211_v7 = vpop.xlane.xlu0 %210 }
  0xab   : > { %v214_v8 = vsub.f32 %v211_v7, %v213_v6 }
  0xad   : > { %v215_v9 = vmul.f32 0.032258064, %v214_v8 }
  0xaf   : > { %v216_v10 = vmax.f32 %v215_v9, 0.0 }
  0xb1   : > { %419 = vrsqrt.f32 %v216_v10  ;;  %vm224_vm1 = vcmp.eq.f32.partialorder %v216_v10, inf  ;;  %v227_v18 = vand.u32 2147483648, %v216_v10  ;;  %vm226_vm2 = vcmp.eq.f32.partialorder %v216_v10, 0.0 }
  0xb7   : > { %v420_v11 = vpop.eup %419 }
  0xb8   : > { %v218_v12 = vmul.f32 %v420_v11, %v216_v10 }
  0xba   : > { %v219_v13 = vmul.f32 %v420_v11, %v218_v12 }
  0xbc   : > { %v220_v14 = vmul.f32 0.5, %v219_v13 }
  0xbe   : > { %v221_v15 = vsub.f32 1.5, %v220_v14 }
  0xc0   : > { %v222_v16 = vmul.f32 %v420_v11, %v221_v15 }
  0xc2   : > { %v223_v17 = vmul.f32 %v222_v16, %v216_v10 }
  0xc4   : > { %v225_v19 = vsel %vm224_vm1, %v216_v10, %v223_v17 }
  0xc5   : > { %v228_v20 = vsel %vm226_vm2, %v227_v18, %v225_v19 }
  0xc6   : > { %v229_v21 = vadd.f32 1e-06, %v228_v20 }
  0xc8   : > { %421 = vrcp.f32 %v229_v21 }
  0xce   : > { %v422_v22 = vpop.eup %421 }
  0xcf   : > { %v231_v23 = vmul.f32 %v422_v22, %v229_v21 }
  0xd1   : > { %v232_v24 = vsub.f32 2.0, %v231_v23 }
  0xd3   : > { %v233_v25 = vmul.f32 %v422_v22, %v232_v24 }
  0xd5   : > { %v234_v26 = vmul.f32 %v233_v25, %v229_v21 }
  0xd7   : > { %v235_v27 = vsub.f32 2.0, %v234_v26 }
  0xd9   : > { %v236_v29 = vmul.f32 %v235_v27, %v233_v25 }
  0xdb   : > { %v240_v31 = vmul.f32 %v239_v28, %v236_v29 }
  0xdd   : > { %v244_v33 = vmul.f32 %v417_v30, %v240_v31 }
  0xdf   : > { %v248_v34 = vadd.f32 %v418_v32, %v244_v33 }
  0xe1   : > { %249 = vst.msk [vmem:[%s202_s21] sm:$0xff] %vm204_vm0, %v248_v34 }
  0xe2   : > { %510 = shalt.err (!%p507_p11)
}
  0xe3   : > { %366 = dma.vmem_to_hbm [thread:$0]  (%p642_p3), %s264_s22, 128, %s266_s24, %s251_s16  }
  0xe4 PF: > { %s277_s4 = sand.u32 1, %s541_s12   ;;  %p733_p12 = scmp.ge.s32.totalorder %s553_s15, 2 }
  0xe5   : > { %s278_s9 = scalar_lea.sflag [#allocation4], %s277_s4 }
  0xe6   : > { %p377_p13 = pnand %p733_p12, %p611_p6 }
  0xe8   : > { %p378_p0 = pneg %p377_p13 }
  0xea   : > { %536 = dma.done.wait (%p378_p0), %s278_s9, 128  }
  0xeb   : > { %538 = vsyncadd (%p378_p0), %s278_s9, 4294967168  ;;  %p17_p5 = scmp.ge.s32.totalorder %s629_s26, 4   ;;  %s734_s12 = smov %s545_s13 }
  0xec   : > { %s735_s13 = smov %s549_s14  ;;  %s736_s14 = smov %s638_s29 }
  0xed   : > { %s737_s15 = smov %s629_s26  ;;  %19 = sbr.rel (!%p17_p5) target bundleno = 6 (0x6), region = 81 }
  0xf2   :  { %284 = vsyncpa [#allocation3], 1 }
  0xf3   :  { %286 = vsyncpa [#allocation3 + $0x1], 1 }
  0xf4   :  { %287 = vsyncpa [#allocation6], 1 }
  0xf5   :  { %288 = vsyncpa [#allocation4], 1 }
  0xf6   :  { %290 = vsyncpa [#allocation4 + $0x1], 1 }

</bundles_post_ra>
